<compile_context>
chip_gen: v7x
topology: tpu7x:2x2x1
jax: 0.10.0
libtpu: 0.0.40
codegen_flags: <defaults>
</compile_context>

<pallas_src>
import functools

import jax
import jax.numpy as jnp
from jax import lax
from jax.experimental import pallas as pl
from jax.experimental.pallas import tpu as pltpu


# --------------------------------------------------------------------------
# Pallas kernel: one row-tile of the fused FFN forward.
# --------------------------------------------------------------------------
def _ffn_kernel(x_ref, w1_ref, b1_ref, w2_ref, b2_ref, gamma_ref, beta_ref,
                out_ref, *, leakiness, eps):
    x = x_ref[...]                                                   # (TM, C)

    # linear1 + LeakyReLU (weights pre-transposed to (in, out) in the wrapper)
    h = jnp.dot(x, w1_ref[...], preferred_element_type=jnp.float32)  # (TM, H)
    h = h + b1_ref[...]
    h = jnp.where(h >= 0, h, h * leakiness)

    # linear2
    out = jnp.dot(h, w2_ref[...], preferred_element_type=jnp.float32)  # (TM, C)
    out = out + b2_ref[...]

    # residual add (torch: out += residual; requires num_input == num_output)
    out = out + x

    # LayerNorm(num_output), elementwise affine, eps=1e-5
    mu = jnp.mean(out, axis=-1, keepdims=True)
    var = jnp.mean((out - mu) ** 2, axis=-1, keepdims=True)
    out = (out - mu) * lax.rsqrt(var + eps)
    out_ref[...] = out * gamma_ref[...] + beta_ref[...]


# --------------------------------------------------------------------------
# Plain-JAX glue: parameter init + pallas_call wrapper.
# --------------------------------------------------------------------------
def init_params(key, num_input, num_hidden, num_output):
    """Mimics torch nn.Linear / nn.LayerNorm default initialization."""
    ks = jax.random.split(key, 4)

    def torch_linear(kw, kb, fan_out, fan_in):
        bound = 1.0 / (fan_in ** 0.5)
        w = jax.random.uniform(kw, (fan_out, fan_in), jnp.float32, -bound, bound)
        b = jax.random.uniform(kb, (fan_out,), jnp.float32, -bound, bound)
        return w, b

    w1, b1 = torch_linear(ks[0], ks[1], num_hidden, num_input)
    w2, b2 = torch_linear(ks[2], ks[3], num_output, num_hidden)
    return {
        "W1": w1, "b1": b1,                       # (H, Cin), (H,)
        "W2": w2, "b2": b2,                       # (Cout, H), (Cout,)
        "gamma": jnp.ones((num_output,), jnp.float32),
        "beta": jnp.zeros((num_output,), jnp.float32),
    }


def ffn_pallas(x, params, *, leakiness=0.0, eps=1e-5, tm=None):
    N, C = x.shape
    H = params["W1"].shape[0]
    assert params["W2"].shape[0] == C, "residual add requires num_input == num_output"

    # Pre-transpose weights to (in, out) so the kernel does y = x @ W.
    w1 = params["W1"].T                          # (C, H)
    w2 = params["W2"].T                          # (H, C)
    b1 = params["b1"].reshape(1, H)
    b2 = params["b2"].reshape(1, C)
    gamma = params["gamma"].reshape(1, C)
    beta = params["beta"].reshape(1, C)

    # Row tile: rows are fully independent, so tile only the token axis.
    if tm is None:
        tm = min(N, 256)
    assert N % tm == 0 and (tm % 8 == 0 or tm == N)
    grid = (N // tm,)

    kernel = functools.partial(_ffn_kernel, leakiness=float(leakiness), eps=eps)
    const2 = lambda i: (0, 0)                    # weights resident across grid

    return pl.pallas_call(
        kernel,
        out_shape=jax.ShapeDtypeStruct((N, C), jnp.float32),
        grid_spec=pltpu.PrefetchScalarGridSpec(
            num_scalar_prefetch=0,
            grid=grid,
            in_specs=[
                pl.BlockSpec((tm, C), lambda i: (i, 0)),   # x  (row tiles)
                pl.BlockSpec((C, H), const2),              # W1
                pl.BlockSpec((1, H), const2),              # b1
                pl.BlockSpec((H, C), const2),              # W2
                pl.BlockSpec((1, C), const2),              # b2
                pl.BlockSpec((1, C), const2),              # gamma
                pl.BlockSpec((1, C), const2),              # beta
            ],
            out_specs=pl.BlockSpec((tm, C), lambda i: (i, 0)),
        ),
        compiler_params=pltpu.CompilerParams(
            dimension_semantics=("parallel",),             # v7x: 2 TCs split rows
            vmem_limit_bytes=32 << 20,
        ),
    )(x, w1, b1, w2, b2, gamma, beta)


# --------------------------------------------------------------------------
# Pure-JAX reference mirroring the torch forward (eval mode: dropout = id).
# --------------------------------------------------------------------------
def ffn_reference(x, params, *, leakiness=0.0, eps=1e-5):
    h = x @ params["W1"].T + params["b1"]
    h = jnp.where(h >= 0, h, h * leakiness)
    out = h @ params["W2"].T + params["b2"]
    out = out + x
    mu = out.mean(-1, keepdims=True)
    var = ((out - mu) ** 2).mean(-1, keepdims=True)
    return (out - mu) / jnp.sqrt(var + eps) * params["gamma"] + params["beta"]


if __name__ == "__main__":
    # Small but lane/sublane-aligned shapes: residual requires Cin == Cout.
    N, num_input, num_hidden, num_output = 64, 128, 256, 128
    leakiness = 0.0                       # module default

    key = jax.random.PRNGKey(0)
    kx, kp = jax.random.split(key)
    x = jax.random.normal(kx, (N, num_input), jnp.float32)
    params = init_params(kp, num_input, num_hidden, num_output)

    out = ffn_pallas(x, params, leakiness=leakiness, tm=32)
    out = jax.block_until_ready(out)

    ref = ffn_reference(x, params, leakiness=leakiness)
    assert out.shape == (N, num_output)
    err = float(jnp.max(jnp.abs(out - ref)))
    assert jnp.allclose(out, ref, atol=1e-4, rtol=1e-4), f"max abs err {err}"
    print("KERNEL_OK")
</pallas_src>

<mosaic_0001>
module attributes {stable_mosaic.version = 11 : i64} {
  func.func @_ffn_kernel(%arg0: i32, %arg1: memref<32x128xf32, #tpu.memory_space<vmem>>, %arg2: memref<128x256xf32, #tpu.memory_space<vmem>>, %arg3: memref<1x256xf32, #tpu.memory_space<vmem>>, %arg4: memref<256x128xf32, #tpu.memory_space<vmem>>, %arg5: memref<1x128xf32, #tpu.memory_space<vmem>>, %arg6: memref<1x128xf32, #tpu.memory_space<vmem>>, %arg7: memref<1x128xf32, #tpu.memory_space<vmem>>, %arg8: memref<32x128xf32, #tpu.memory_space<vmem>>) attributes {dimension_semantics = [#tpu.dimension_semantics<parallel>], iteration_bounds = array<i64: 2>, scalar_prefetch = 0 : i64, scratch_operands = 0 : i64, tpu.core_type = #tpu.core_type<tc>, window_params = [{transform_indices = @transform_0, window_bounds = array<i64: 32, 128>}, {pipeline_mode = #tpu.pipeline_mode<synchronous>, transform_indices = @transform_1, window_bounds = array<i64: 128, 256>}, {pipeline_mode = #tpu.pipeline_mode<synchronous>, transform_indices = @transform_2, window_bounds = array<i64: 1, 256>}, {pipeline_mode = #tpu.pipeline_mode<synchronous>, transform_indices = @transform_3, window_bounds = array<i64: 256, 128>}, {pipeline_mode = #tpu.pipeline_mode<synchronous>, transform_indices = @transform_4, window_bounds = array<i64: 1, 128>}, {pipeline_mode = #tpu.pipeline_mode<synchronous>, transform_indices = @transform_5, window_bounds = array<i64: 1, 128>}, {pipeline_mode = #tpu.pipeline_mode<synchronous>, transform_indices = @transform_6, window_bounds = array<i64: 1, 128>}, {transform_indices = @transform_7, window_bounds = array<i64: 32, 128>}]} {
    %c0 = arith.constant 0 : index
    %c0_0 = arith.constant 0 : index
    %0 = vector.load %arg1[%c0, %c0_0] : memref<32x128xf32, #tpu.memory_space<vmem>>, vector<32x128xf32>
    %c0_1 = arith.constant 0 : index
    %c0_2 = arith.constant 0 : index
    %1 = vector.load %arg2[%c0_1, %c0_2] : memref<128x256xf32, #tpu.memory_space<vmem>>, vector<128x256xf32>
    %cst = arith.constant dense<0.000000e+00> : vector<32x256xf32>
    %2 = tpu.matmul %0, %1, %cst {dimension_numbers = #tpu.dot_dimension_numbers<[1], [0], [0], [1], [0, 0, 1, 1], [], []>} : vector<32x128xf32>, vector<128x256xf32>, vector<32x256xf32> -> vector<32x256xf32>
    %c0_3 = arith.constant 0 : index
    %c0_4 = arith.constant 0 : index
    %3 = vector.load %arg3[%c0_3, %c0_4] : memref<1x256xf32, #tpu.memory_space<vmem>>, vector<1x256xf32>
    %4 = vector.broadcast %3 : vector<1x256xf32> to vector<32x256xf32>
    %5 = arith.addf %2, %4 : vector<32x256xf32>
    %cst_5 = arith.constant 0.000000e+00 : f32
    %6 = vector.broadcast %cst_5 : f32 to vector<32x256xf32>
    %7 = arith.cmpf oge, %5, %6 : vector<32x256xf32>
    %cst_6 = arith.constant 0.000000e+00 : f32
    %8 = vector.broadcast %cst_6 : f32 to vector<32x256xf32>
    %9 = arith.mulf %5, %8 : vector<32x256xf32>
    %10 = arith.select %7, %5, %9 : vector<32x256xi1>, vector<32x256xf32>
    %c0_7 = arith.constant 0 : index
    %c0_8 = arith.constant 0 : index
    %11 = vector.load %arg4[%c0_7, %c0_8] : memref<256x128xf32, #tpu.memory_space<vmem>>, vector<256x128xf32>
    %cst_9 = arith.constant dense<0.000000e+00> : vector<32x128xf32>
    %12 = tpu.matmul %10, %11, %cst_9 {dimension_numbers = #tpu.dot_dimension_numbers<[1], [0], [0], [1], [0, 0, 1, 1], [], []>} : vector<32x256xf32>, vector<256x128xf32>, vector<32x128xf32> -> vector<32x128xf32>
    %c0_10 = arith.constant 0 : index
    %c0_11 = arith.constant 0 : index
    %13 = vector.load %arg5[%c0_10, %c0_11] : memref<1x128xf32, #tpu.memory_space<vmem>>, vector<1x128xf32>
    %14 = vector.broadcast %13 : vector<1x128xf32> to vector<32x128xf32>
    %15 = arith.addf %12, %14 : vector<32x128xf32>
    %16 = arith.addf %15, %0 : vector<32x128xf32>
    %cst_12 = arith.constant dense<0.000000e+00> : vector<32xf32>
    %17 = vector.multi_reduction <add>, %16, %cst_12 [1] : vector<32x128xf32> to vector<32xf32>
    %18 = vector.shape_cast %17 : vector<32xf32> to vector<32x1xf32>
    %cst_13 = arith.constant 1.280000e+02 : f32
    %19 = vector.broadcast %cst_13 : f32 to vector<32x1xf32>
    %20 = arith.divf %18, %19 : vector<32x1xf32>
    %21 = vector.broadcast %20 : vector<32x1xf32> to vector<32x128xf32>
    %22 = arith.subf %16, %21 : vector<32x128xf32>
    %23 = arith.mulf %22, %22 : vector<32x128xf32>
    %cst_14 = arith.constant dense<0.000000e+00> : vector<32xf32>
    %24 = vector.multi_reduction <add>, %23, %cst_14 [1] : vector<32x128xf32> to vector<32xf32>
    %25 = vector.shape_cast %24 : vector<32xf32> to vector<32x1xf32>
    %cst_15 = arith.constant 1.280000e+02 : f32
    %26 = vector.broadcast %cst_15 : f32 to vector<32x1xf32>
    %27 = arith.divf %25, %26 : vector<32x1xf32>
    %28 = vector.broadcast %20 : vector<32x1xf32> to vector<32x128xf32>
    %29 = arith.subf %16, %28 : vector<32x128xf32>
    %cst_16 = arith.constant 9.99999974E-6 : f32
    %30 = vector.broadcast %cst_16 : f32 to vector<32x1xf32>
    %31 = arith.addf %27, %30 : vector<32x1xf32>
    %32 = math.rsqrt %31 : vector<32x1xf32>
    %33 = vector.broadcast %32 : vector<32x1xf32> to vector<32x128xf32>
    %34 = arith.mulf %29, %33 : vector<32x128xf32>
    %c0_17 = arith.constant 0 : index
    %c0_18 = arith.constant 0 : index
    %35 = vector.load %arg6[%c0_17, %c0_18] : memref<1x128xf32, #tpu.memory_space<vmem>>, vector<1x128xf32>
    %36 = vector.broadcast %35 : vector<1x128xf32> to vector<32x128xf32>
    %37 = arith.mulf %34, %36 : vector<32x128xf32>
    %c0_19 = arith.constant 0 : index
    %c0_20 = arith.constant 0 : index
    %38 = vector.load %arg7[%c0_19, %c0_20] : memref<1x128xf32, #tpu.memory_space<vmem>>, vector<1x128xf32>
    %39 = vector.broadcast %38 : vector<1x128xf32> to vector<32x128xf32>
    %40 = arith.addf %37, %39 : vector<32x128xf32>
    %c0_21 = arith.constant 0 : index
    %c0_22 = arith.constant 0 : index
    %41 = vector.load %arg8[%c0_21, %c0_22] : memref<32x128xf32, #tpu.memory_space<vmem>>, vector<32x128xf32>
    tpu.vector_store %arg8[%c0_21, %c0_22], %40 {strides = array<i32>} : memref<32x128xf32, #tpu.memory_space<vmem>>, vector<32x128xf32>,
    return
  }
  func.func @transform_0(%arg0: i32) -> (i32, i32) {
    %c0_i32 = arith.constant 0 : i32
    %c0_i32_0 = arith.constant 0 : i32
    return %arg0, %c0_i32 : i32, i32
  }
  func.func @transform_1(%arg0: i32) -> (i32, i32) {
    %c0_i32 = arith.constant 0 : i32
    %c0_i32_0 = arith.constant 0 : i32
    %c0_i32_1 = arith.constant 0 : i32
    return %c0_i32, %c0_i32_0 : i32, i32
  }
  func.func @transform_2(%arg0: i32) -> (i32, i32) {
    %c0_i32 = arith.constant 0 : i32
    %c0_i32_0 = arith.constant 0 : i32
    %c0_i32_1 = arith.constant 0 : i32
    return %c0_i32, %c0_i32_0 : i32, i32
  }
  func.func @transform_3(%arg0: i32) -> (i32, i32) {
    %c0_i32 = arith.constant 0 : i32
    %c0_i32_0 = arith.constant 0 : i32
    %c0_i32_1 = arith.constant 0 : i32
    return %c0_i32, %c0_i32_0 : i32, i32
  }
  func.func @transform_4(%arg0: i32) -> (i32, i32) {
    %c0_i32 = arith.constant 0 : i32
    %c0_i32_0 = arith.constant 0 : i32
    %c0_i32_1 = arith.constant 0 : i32
    return %c0_i32, %c0_i32_0 : i32, i32
  }
  func.func @transform_5(%arg0: i32) -> (i32, i32) {
    %c0_i32 = arith.constant 0 : i32
    %c0_i32_0 = arith.constant 0 : i32
    %c0_i32_1 = arith.constant 0 : i32
    return %c0_i32, %c0_i32_0 : i32, i32
  }
  func.func @transform_6(%arg0: i32) -> (i32, i32) {
    %c0_i32 = arith.constant 0 : i32
    %c0_i32_0 = arith.constant 0 : i32
    %c0_i32_1 = arith.constant 0 : i32
    return %c0_i32, %c0_i32_0 : i32, i32
  }
  func.func @transform_7(%arg0: i32) -> (i32, i32) {
    %c0_i32 = arith.constant 0 : i32
    %c0_i32_0 = arith.constant 0 : i32
    return %arg0, %c0_i32 : i32, i32
  }
}

</mosaic_0001>

<bundles_post_ra>
// kernel: tpu_custom_call.1
= control target key start
LH: loop header
LB: loop body
LE: loop exit
PB: predicated region body
PF: predicated region fallthrough
CT: control target
= control target key end

     0   :  { %12 = vsyncpa [#allocation3], 0  ;;  %s1498_s0 = inlined_call_operand.hbm [shape: f32[64,128], index: 0, kind: input, shape index: {}]   ;;  %s1499_s1 = inlined_call_operand.hbm [shape: f32[128,256], index: 1, kind: input, shape index: {}]   ;;  %s1500_s2 = inlined_call_operand.vmem [shape: f32[1,256], index: 2, kind: input, shape index: {}]   ;;  %s1501_s3 = inlined_call_operand.hbm [shape: f32[256,128], index: 3, kind: input, shape index: {}]   ;;  %s1502_s4 = inlined_call_operand.vmem [shape: f32[1,128], index: 4, kind: input, shape index: {}]   ;;  %s1503_s5 = inlined_call_operand.vmem [shape: f32[1,128], index: 5, kind: input, shape index: {}]   ;;  %s1504_s6 = inlined_call_operand.vmem [shape: f32[1,128], index: 6, kind: input, shape index: {}]   ;;  %s1505_s7 = inlined_call_operand.hbm [shape: f32[64,128], index: 7, kind: output, shape index: {}]  }
   0x1   :  { %14 = vsyncpa [#allocation3 + $0x1], 0 }
   0x2   :  { %15 = vsyncpa [#allocation6], 0 }
   0x3   :  { %16 = vsyncpa [#allocation4], 0 }
   0x4   :  { %18 = vsyncpa [#allocation4 + $0x1], 0  ;;  %s1216_s24 = smov 0   ;;  %s1218_s25 = smov 0  }
   0x5   :  { %s1220_s26 = smov 0   ;;  %s1222_s27 = smov 0  }
   0x6 LB: > { %s1237_s28 = sadd.s32 4294967295, %s1163_s27   ;;  %s794_s29 = sadd.s32 4294967294, %s1163_s27   ;;  %s1163_s27 = sphi %s1222_s27, %s1527_s27   ;;  %s1159_s26 = sphi %s1220_s26, %s1526_s26   ;;  %s1155_s25 = sphi %s1218_s25, %s1525_s25   ;;  %s1151_s24 = sphi %s1216_s24, %s1524_s24  }
   0x7   : > { %p44_p0 = scmp.ne.s32.totalorder %s1155_s25, %s1151_s24  ;;  %p1506_p1 = scmp.eq.s32.totalorder %s1237_s28, 0 }
   0x8   : > { %p200_p3 = scmp.eq.s32.totalorder %s794_s29, 1  ;;  %p795_p5 = scmp.ge.s32.totalorder %s1163_s27, 1 }
   0x9   : > { %p1246_p4 = por %p1506_p1, %p44_p0  ;;  %p207_p7 = scmp.lt.s32.totalorder %s1163_s27, 3 }
   0xa   : > { %p1251_p6 = por %p200_p3, %p44_p0  ;;  %s1165_s10 = smov [#allocation5]  }
   0xb   : > { %s1510_s30 = scalar_select %p1246_p4, 1, 0 }
   0xc   : > { %s1511_s8 = scalar_select %p1251_p6, 1, 0 }
   0xd   : > { %p1256_p8 = pnand %p795_p5, %p207_p7  ;;  %s219_s11 = sshll.u32 %s1165_s10, 4  ;;  %s1260_s11 = int_to_ptr.vmem [resolvable:$true] %s219_s11 }
   0xe   : > { %s1166_s13 = smov [#allocation7]   ;;  %s1007_s17 = scalar_lea.hbm %s1499_s1, 4096 }
   0xf   : > { %p937_p9 = pneg %p1256_p8  ;;  %s235_s14 = sshll.u32 %s1166_s13, 4  ;;  %s1271_s14 = int_to_ptr.vmem [resolvable:$true] %s235_s14 }
  0x10   : > { %p1008_p12 = scmp.ne.s32.totalorder %s1499_s1, %s1007_s17  ;;  %p1014_p5 = scmp.lt.u32.totalorder %s1007_s17, %s1499_s1 }
  0x11   : > { %p1267_p11 = pnand %p937_p9, %p1506_p1 }
  0x13   : > { %p1009_p13 = pneg %p1267_p11 }
  0x15   : > { %p1010_p0 = pnand %p1009_p13, %p1008_p12 }
  0x17   : > { %p1011_p3 = pneg %p1010_p0 }
  0x19   : > { %p1016_p7 = pnand %p1014_p5, %p1011_p3 }
  0x1b   : > { %1019 = shalt.err (!%p1016_p7)
}
  0x1c   : > { %s1020_s22 = scalar_lea.vmem %s1260_s11, 4096  ;;  %p1028_p2 = scmp.lt.s32.totalorder %s1260_s11, %s1260_s11 }
  0x1d   : > { %p1021_p9 = scmp.ne.s32.totalorder %s1260_s11, %s1020_s22  ;;  %p1029_p12 = scmp.lt.s32.totalorder %s1020_s22, %s1020_s22 }
  0x1f   : > { %p1023_p10 = pnand %p1021_p9, %p1009_p13  ;;  %p1030_p0 = por %p1029_p12, %p1028_p2 }
  0x21   : > { %p1024_p1 = pneg %p1023_p10 }
  0x23   : > { %p1031_p6 = pnand %p1030_p0, %p1024_p1 }
  0x25   : > { %1034 = shalt.err (!%p1031_p6)
}
  0x26   : > { %s1167_s23 = smov 256   ;;  %s1168_s29 = smov 16  }
  0x27   : > { %940 = dma.hbm_to_vmem [thread:$0]  (!%p1267_p11), %s1499_s1, 4096, %s1260_s11, [#allocation6], %s1167_s23, %s1167_s23, %s1168_s29  }
  0x28   : > { %s1035_s17 = scalar_lea.hbm %s1501_s3, 4096 }
  0x29   : > { %p1036_p2 = scmp.ne.s32.totalorder %s1501_s3, %s1035_s17  ;;  %p1042_p10 = scmp.lt.u32.totalorder %s1035_s17, %s1501_s3 }
  0x2b   : > { %p1038_p1 = pnand %p1036_p2, %p1009_p13 }
  0x2d   : > { %p1039_p6 = pneg %p1038_p1 }
  0x2f   : > { %p1044_p3 = pnand %p1042_p10, %p1039_p6 }
  0x31   : > { %1047 = shalt.err (!%p1044_p3)
}
  0x32   : > { %s1048_s11 = scalar_lea.vmem %s1271_s14, 4096  ;;  %p1056_p12 = scmp.lt.s32.totalorder %s1271_s14, %s1271_s14 }
  0x33   : > { %p1049_p5 = scmp.ne.s32.totalorder %s1271_s14, %s1048_s11  ;;  %p1057_p0 = scmp.lt.s32.totalorder %s1048_s11, %s1048_s11 }
  0x35   : > { %p1051_p7 = pnand %p1049_p5, %p1009_p13  ;;  %p1058_p2 = por %p1057_p0, %p1056_p12 }
  0x37   : > { %p1052_p9 = pneg %p1051_p7 }
  0x39   : > { %p1059_p1 = pnand %p1058_p2, %p1052_p9 }
  0x3b   : > { %1062 = shalt.err (!%p1059_p1)
}
  0x3c   : > { %s1507_s22 = smov 128   ;;  %s1170_s23 = smov 8  }
  0x3d   : > { %943 = dma.hbm_to_vmem [thread:$0]  (!%p1267_p11), %s1501_s3, 4096, %s1271_s14, [#allocation6], %s1507_s22, %s1507_s22, %s1170_s23  }
  0x3e   : > { %s1329_s13 = sadd.s32 1, %s1163_s27   ;;  %s31_s16 = sadd.s32 1, %s1159_s26 }
  0x3f   : > { %s28_s15 = ssub.s32 %s1163_s27, %s1329_s13  ;;  %p38_p6 = scmp.ne.s32.totalorder %s1159_s26, %s1155_s25 }
  0x40   : > { %p29_p13 = scmp.eq.s32.totalorder %s28_s15, 0  ;;  %p39_p10 = scmp.eq.s32.totalorder %s1163_s27, 0 }
  0x41   : > { %p1514_p5 = scmp.eq.s32.totalorder %s1237_s28, 1  ;;  %p954_p9 = scmp.lt.s32.totalorder %s1163_s27, 2 }
  0x42   : > { %s1338_s17 = scalar_select %p29_p13, %s1159_s26, %s31_s16  }
  0x43   : > { %p40_p3 = por %p39_p10, %p38_p6  ;;  %p1342_p7 = por %p1514_p5, %p38_p6 }
  0x44   : > { %s258_s18 = sand.u32 1, %s1159_s26   ;;  %s815_s14 = sshll.u32 %s1163_s27, 9 }
  0x45   : > { %s1515_s12 = scalar_select %p1342_p7, 1, 0 }
  0x46   : > { %s799_s19 = sshll.u32 %s258_s18, 5  ;;  %s1352_s11 = scalar_lea.hbm %s1498_s0, %s815_s14 }
  0x47   : > { %s262_s29 = scalar_lea.vmem [#allocation2], %s799_s19  ;;  %p1356_p11 = pnand %p954_p9, %p40_p3 }
  0x48   : > { %s269_s10 = sshll.u32 %s262_s29, 4  ;;  %s1360_s16 = scalar_lea.sflag [#allocation3], %s258_s18  ;;  %s1354_s10 = int_to_ptr.vmem [resolvable:$true] %s269_s10 }
  0x49   : > { %s1063_s22 = scalar_lea.hbm %s1352_s11, 512  ;;  %p1065_p0 = pneg %p1356_p11 }
  0x4a   : > { %p1064_p12 = scmp.ne.s32.totalorder %s1352_s11, %s1063_s22  ;;  %s1068_s20 = scalar_lea.hbm %s1498_s0, 1024 }
  0x4b   : > { %p1069_p13 = scmp.lt.u32.totalorder %s1352_s11, %s1498_s0  ;;  %p1070_p6 = scmp.lt.u32.totalorder %s1068_s20, %s1063_s22 }
  0x4c   : > { %p1066_p2 = pnand %p1065_p0, %p1064_p12  ;;  %p1072_p3 = scmp.lt.u32.totalorder %s1063_s22, %s1352_s11 }
  0x4d   : > { %p1071_p10 = por %p1070_p6, %p1069_p13 }
  0x4e   : > { %p1067_p1 = pneg %p1066_p2 }
  0x4f   : > { %p1073_p5 = por %p1072_p3, %p1071_p10 }
  0x51   : > { %p1074_p9 = pnand %p1073_p5, %p1067_p1 }
  0x53   : > { %1077 = shalt.err (!%p1074_p9)
}
  0x54   : > { %s1078_s18 = scalar_lea.vmem %s1354_s10, 512  ;;  %s1171_s19 = smov [#allocation2]  }
  0x55   : > { %p1079_p12 = scmp.ne.s32.totalorder %s1354_s10, %s1078_s18  ;;  %s1083_s14 = sshll.u32 %s1171_s19, 4  ;;  %s1084_s14 = int_to_ptr.vmem [resolvable:$false] %s1083_s14 }
  0x56   : > { %s1085_s21 = scalar_lea.vmem %s1084_s14, 1024  ;;  %p1086_p4 = scmp.lt.s32.totalorder %s1354_s10, %s1084_s14 }
  0x57   : > { %p1081_p2 = pnand %p1079_p12, %p1065_p0  ;;  %p1087_p13 = scmp.lt.s32.totalorder %s1085_s21, %s1078_s18 }
  0x59   : > { %p1082_p7 = pneg %p1081_p2  ;;  %p1088_p6 = por %p1087_p13, %p1086_p4 }
  0x5b   : > { %p1089_p10 = pnand %p1088_p6, %p1082_p7 }
  0x5d   : > { %1092 = shalt.err (!%p1089_p10)
}
  0x5e   : > { %s1517_s22 = smov 128   ;;  %281 = sbr.rel (%p1256_p8) target bundleno = 916 (0x394), region = 48 }
  0x5f   : > { %947 = dma.hbm_to_vmem [thread:$0]  (!%p1356_p11), %s1352_s11, 512, %s1354_s10, %s1360_s16, %s1517_s22, %s1517_s22, %s1170_s23  }
  0x60   : > { %s1394_s20 = sand.u32 (!%p1256_p8), 1, %s1155_s25   ;;  %p1518_p4 = scmp.ne.s32.totalorder (!%p1256_p8), %s1510_s30, 0 }
  0x61   : > { %s803_s29 = sshll.u32 (!%p1256_p8), %s1394_s20, 5  ;;  %s284_s18 = scalar_lea.sflag (!%p1256_p8), [#allocation3], %s1394_s20 }
  0x62   : > { %s1400_s15 = scalar_lea.vmem (!%p1256_p8), [#allocation2], %s803_s29 }
  0x65   : > { %1138 = dma.done.wait (%p1518_p4), %s284_s18, 512  }
  0x66   : > { %1140 = vsyncadd (%p1518_p4), %s284_s18, 4294966784  ;;  %p1519_p7 = scmp.eq.s32.totalorder %s1237_s28, 0 }
  0x68   : > { %1142 = dma.done.wait (%p1519_p7), [#allocation6], 8192   ;;  %p1520_p8 = pmov %p1519_p7 }
  0x69   : > { %v1172_v0 = vmov 0.0   ;;  %v333_v1 = vld [vmem:[#allocation5 + $0x8] sm:$0xff]  ;;  %v335_v2 = vld [vmem:[#allocation5 + $0x18] sm:$0xff]  ;;  %v332_v3 = vld [vmem:[#allocation5] sm:$0xff]  ;;  %s325_s21 = scalar_lea.vmem [#allocation8], %s803_s29  ;;  %s816_s22 = sshll.u32 %s1237_s28, 9 }
  0x6a   : > { %1144 = vsyncadd (%p1520_p8), [#allocation6], 4294959104  ;;  %440 = vmatprep.mubr.f32.mxu0 %v1172_v0  ;;  %v861_v4 = vpack.c.bf16 %v335_v2, %v333_v1  ;;  %v334_v5 = vld [vmem:[#allocation5 + $0x10] sm:$0xff]  ;;  %v337_v6 = vld [vmem:[#allocation5 + $0x28] sm:$0xff]  ;;  %s702_s18 = sshll.u32 %s325_s21, 4  ;;  %s1452_s29 = scalar_lea.hbm %s1505_s7, %s816_s22  ;;  %s1454_s18 = int_to_ptr.vmem [resolvable:$true] %s702_s18 }
  0x6b   : > { %v339_v7 = vld [vmem:[#allocation5 + $0x38] sm:$0xff]  ;;  %v863_v8 = vpack.c.bf16 %v334_v5, %v332_v3  ;;  %v336_v10 = vld [vmem:[#allocation5 + $0x20] sm:$0xff]  ;;  %v338_v11 = vld [vmem:[#allocation5 + $0x30] sm:$0xff]  ;;  %s689_s9 = scalar_lea.sflag [#allocation4], %s1394_s20  ;;  %s1093_s23 = scalar_lea.vmem %s1454_s18, 512 }
  0x6c   : > { %v865_v9 = vpack.c.bf16 %v339_v7, %v337_v6  ;;  %v341_v12 = vld [vmem:[#allocation5 + $0x48] sm:$0xff]  ;;  %862 = vmatprep.subr.bf16.mxu0 %v861_v4  ;;  %v343_v13 = vld [vmem:[#allocation5 + $0x58] sm:$0xff]  ;;  %v867_v14 = vpack.c.bf16 %v338_v11, %v336_v10  ;;  %v340_v16 = vld [vmem:[#allocation5 + $0x40] sm:$0xff]  ;;  %p1094_p11 = scmp.ne.s32.totalorder %s1454_s18, %s1093_s23  ;;  %p1521_p0 = scmp.ne.s32.totalorder %s1515_s12, 0 }
  0x6d   : > { %864 = vmatpush1.bf16.msra.mxu0 %v863_v8  ;;  %v869_v15 = vpack.c.bf16 %v343_v13, %v341_v12  ;;  %v342_v17 = vld [vmem:[#allocation5 + $0x50] sm:$0xff]  ;;  %v345_v18 = vld [vmem:[#allocation5 + $0x68] sm:$0xff]  ;;  %v347_v19 = vld [vmem:[#allocation5 + $0x78] sm:$0xff]  ;;  %s1173_s28 = smov [#allocation8]  }
  0x6e   : > { %866 = vmatprep.subr.bf16.mxu0 %v865_v9  ;;  %v871_v20 = vpack.c.bf16 %v342_v17, %v340_v16  ;;  %v873_v21 = vpack.c.bf16 %v347_v19, %v345_v18  ;;  %v344_v22 = vld [vmem:[#allocation5 + $0x60] sm:$0xff]  ;;  %v346_v23 = vld [vmem:[#allocation5 + $0x70] sm:$0xff]  ;;  %v349_v24 = vld [vmem:[#allocation5 + $0x88] sm:$0xff]  ;;  %p1095_p1 = pnand %p1094_p11, %p1521_p0  ;;  %s1097_s11 = sshll.u32 %s1173_s28, 4  ;;  %s1098_s11 = int_to_ptr.vmem [resolvable:$false] %s1097_s11 }
  0x6f   : > { %v351_v25 = vld [vmem:[#allocation5 + $0x98] sm:$0xff]  ;;  %v348_v26 = vld [vmem:[#allocation5 + $0x80] sm:$0xff]  ;;  %v350_v27 = vld [vmem:[#allocation5 + $0x90] sm:$0xff]  ;;  %v875_v28 = vpack.c.bf16 %v346_v23, %v344_v22  ;;  %s1099_s10 = scalar_lea.vmem %s1098_s11, 1024  ;;  %p1100_p5 = scmp.lt.s32.totalorder %s1454_s18, %s1098_s11 }
  0x70   : > { %v353_v29 = vld [vmem:[#allocation5 + $0xa8] sm:$0xff]  ;;  %v355_v30 = vld [vmem:[#allocation5 + $0xb8] sm:$0xff]  ;;  %v505_v31 = vld [vmem:[#allocation7 + $0x80] sm:$0xff]  ;;  %v877_v34 = vpack.c.bf16 %v351_v25, %v349_v24  ;;  %v879_v45 = vpack.c.bf16 %v350_v27, %v348_v26  ;;  %p1096_p3 = pneg %p1095_p1  ;;  %p1101_p9 = scmp.lt.s32.totalorder %s1099_s10, %s1093_s23 }
  0x71   : > { %868 = vmatpush1.bf16.msra.mxu0 %v867_v14  ;;  %v506_v32 = vld [vmem:[#allocation7 + $0x88] sm:$0xff]  ;;  %v489_v33 = vld [vmem:[#allocation7] sm:$0xff]  ;;  %v507_v37 = vld [vmem:[#allocation7 + $0x90] sm:$0xff]  ;;  %v881_v49 = vpack.c.bf16 %v355_v30, %v353_v29 }
  0x72   : > { %870 = vmatprep.subr.bf16.mxu0 %v869_v15  ;;  %v893_v35 = vpack.c.bf16 %v506_v32, %v505_v31  ;;  %v490_v36 = vld [vmem:[#allocation7 + $0x8] sm:$0xff]  ;;  %v508_v38 = vld [vmem:[#allocation7 + $0x98] sm:$0xff]  ;;  %v491_v41 = vld [vmem:[#allocation7 + $0x10] sm:$0xff]  ;;  %p1102_p12 = por %p1101_p9, %p1100_p5 }
  0x73   : > { %v895_v39 = vpack.c.bf16 %v490_v36, %v489_v33  ;;  %v897_v40 = vpack.c.bf16 %v508_v38, %v507_v37  ;;  %v492_v42 = vld [vmem:[#allocation7 + $0x18] sm:$0xff]  ;;  %v509_v43 = vld [vmem:[#allocation7 + $0xa0] sm:$0xff]  ;;  %v510_v44 = vld [vmem:[#allocation7 + $0xa8] sm:$0xff] }
  0x74   : > { %894 = vmatprep.subr.bf16.mxu1 %v893_v35  ;;  %v352_v46 = vld [vmem:[#allocation5 + $0xa0] sm:$0xff]  ;;  %v354_v47 = vld [vmem:[#allocation5 + $0xb0] sm:$0xff]  ;;  %v899_v48 = vpack.c.bf16 %v492_v42, %v491_v41  ;;  %v357_v50 = vld [vmem:[#allocation5 + $0xc8] sm:$0xff]  ;;  %v901_v51 = vpack.c.bf16 %v510_v44, %v509_v43  ;;  %p1103_p2 = pnand %p1102_p12, %p1096_p3 }
  0x75   : > { %872 = vmatpush1.bf16.msra.mxu0 %v871_v20  ;;  %896 = vmatpush3.bf16.msra.mxu1 %v895_v39  ;;  %v493_v52 = vld [vmem:[#allocation7 + $0x20] sm:$0xff]  ;;  %v494_v53 = vld [vmem:[#allocation7 + $0x28] sm:$0xff]  ;;  %v359_v54 = vld [vmem:[#allocation5 + $0xd8] sm:$0xff]  ;;  %v883_v57 = vpack.c.bf16 %v354_v47, %v352_v46 }
  0x76   : > { %874 = vmatprep.subr.bf16.mxu0 %v873_v21  ;;  %898 = vmatprep.subr.bf16.mxu1 %v897_v40  ;;  %v511_v55 = vld [vmem:[#allocation7 + $0xb0] sm:$0xff]  ;;  %v512_v56 = vld [vmem:[#allocation7 + $0xb8] sm:$0xff]  ;;  %v356_v58 = vld [vmem:[#allocation5 + $0xc0] sm:$0xff]  ;;  %v903_v60 = vpack.c.bf16 %v494_v53, %v493_v52  ;;  %v885_v61 = vpack.c.bf16 %v359_v54, %v357_v50 }
  0x77   : > { %v358_v59 = vld [vmem:[#allocation5 + $0xd0] sm:$0xff]  ;;  %v361_v62 = vld [vmem:[#allocation5 + $0xe8] sm:$0xff]  ;;  %v905_v63 = vpack.c.bf16 %v512_v56, %v511_v55  ;;  %v496_v2 = vld [vmem:[#allocation7 + $0x38] sm:$0xff] }
  0x78   : > { %v495_v1 = vld [vmem:[#allocation7 + $0x30] sm:$0xff]  ;;  %v363_v3 = vld [vmem:[#allocation5 + $0xf8] sm:$0xff]  ;;  %v513_v4 = vld [vmem:[#allocation7 + $0xc0] sm:$0xff]  ;;  %v887_v6 = vpack.c.bf16 %v358_v59, %v356_v58 }
  0x79   : > { %876 = vmatpush1.bf16.msra.mxu0 %v875_v28  ;;  %900 = vmatpush3.bf16.msra.mxu1 %v899_v48  ;;  %v514_v5 = vld [vmem:[#allocation7 + $0xc8] sm:$0xff]  ;;  %v360_v7 = vld [vmem:[#allocation5 + $0xe0] sm:$0xff]  ;;  %v907_v8 = vpack.c.bf16 %v496_v2, %v495_v1  ;;  %v889_v9 = vpack.c.bf16 %v363_v3, %v361_v62  ;;  %v362_v10 = vld [vmem:[#allocation5 + $0xf0] sm:$0xff] }
  0x7a   : > { %878 = vmatprep.subr.bf16.mxu0 %v877_v34  ;;  %902 = vmatprep.subr.bf16.mxu1 %v901_v51  ;;  %v909_v11 = vpack.c.bf16 %v514_v5, %v513_v4  ;;  %v497_v12 = vld [vmem:[#allocation7 + $0x40] sm:$0xff]  ;;  %v498_v13 = vld [vmem:[#allocation7 + $0x48] sm:$0xff]  ;;  %v515_v14 = vld [vmem:[#allocation7 + $0xd0] sm:$0xff]  ;;  %v891_v16 = vpack.c.bf16 %v362_v10, %v360_v7 }
  0x7b   : > { %v516_v15 = vld [vmem:[#allocation7 + $0xd8] sm:$0xff]  ;;  %v911_v17 = vpack.c.bf16 %v498_v13, %v497_v12  ;;  %v499_v19 = vld [vmem:[#allocation7 + $0x50] sm:$0xff]  ;;  %v1412_v21 = vld [vmem:[%s1400_s15] sm:$0xff] }
  0x7c   : > { %v913_v18 = vpack.c.bf16 %v516_v15, %v515_v14  ;;  %v500_v20 = vld [vmem:[#allocation7 + $0x58] sm:$0xff]  ;;  %v1417_v23 = vld [vmem:[%s1400_s15 + $0x8] sm:$0xff]  ;;  %v1422_v24 = vld [vmem:[%s1400_s15 + $0x10] sm:$0xff] }
  0x7d   : > { %880 = vmatpush1.bf16.msra.mxu0 %v879_v45  ;;  %904 = vmatpush3.bf16.msra.mxu1 %v903_v60  ;;  %v915_v22 = vpack.c.bf16 %v500_v20, %v499_v19  ;;  %v1427_v25 = vld [vmem:[%s1400_s15 + $0x18] sm:$0xff]  ;;  %v517_v26 = vld [vmem:[#allocation7 + $0xe0] sm:$0xff]  ;;  %v518_v27 = vld [vmem:[#allocation7 + $0xe8] sm:$0xff] }
  0x7e   : > { %882 = vmatprep.subr.bf16.mxu0 %v881_v49  ;;  %906 = vmatprep.subr.bf16.mxu1 %v905_v63  ;;  %v917_v28 = vpack.c.bf16 %v518_v27, %v517_v26  ;;  %v501_v29 = vld [vmem:[#allocation7 + $0x60] sm:$0xff]  ;;  %v502_v30 = vld [vmem:[#allocation7 + $0x68] sm:$0xff]  ;;  %v519_v32 = vld [vmem:[#allocation7 + $0xf0] sm:$0xff] }
  0x7f   : > { %v919_v31 = vpack.c.bf16 %v502_v30, %v501_v29  ;;  %v520_v33 = vld [vmem:[#allocation7 + $0xf8] sm:$0xff]  ;;  %v503_v35 = vld [vmem:[#allocation7 + $0x70] sm:$0xff]  ;;  %v364_v40 = vld [vmem:[%s1500_s2] sm:$0x3] }
  0x80   : > { %v921_v34 = vpack.c.bf16 %v520_v33, %v519_v32  ;;  %v504_v36 = vld [vmem:[#allocation7 + $0x78] sm:$0xff]  ;;  %v807_v14 = vld [vmem:[%s1502_s4] ss:$0 sm:$0xff] }
  0x81   : > { %884 = vmatpush1.bf16.msra.mxu0 %v883_v57  ;;  %908 = vmatpush3.bf16.msra.mxu1 %v907_v8  ;;  %v923_v37 = vpack.c.bf16 %v504_v36, %v503_v35 }
  0x82   : > { %886 = vmatprep.subr.bf16.mxu0 %v885_v61  ;;  %910 = vmatprep.subr.bf16.mxu1 %v909_v11 }
  0x85   : > { %888 = vmatpush1.bf16.msra.mxu0 %v887_v6  ;;  %912 = vmatpush3.bf16.msra.mxu1 %v911_v17 }
  0x86   : > { %890 = vmatprep.subr.bf16.mxu0 %v889_v9  ;;  %914 = vmatprep.subr.bf16.mxu1 %v913_v18 }
  0x89   : > { %892 = vmatpush1.bf16.msra.mxu0 %v891_v16  ;;  %916 = vmatpush3.bf16.msra.mxu1 %v915_v22 }
  0x8a   : > { %918 = vmatprep.subr.bf16.mxu1 %v917_v28 }
  0x8c   : > { %441 = vmatmul.mubr.f32.vlgmr.msra.gmra.mrb[0].mxu0 %v1412_v21 }
  0x8d   : > { %446 = vmatprep.mubr.f32.mxu0 %v1172_v0  ;;  %920 = vmatpush3.bf16.msra.mxu1 %v919_v31 }
  0x8e   : > { %922 = vmatprep.subr.bf16.mxu1 %v921_v34 }
  0x90   : > { %447 = vmatmul.mubr.f32.gmra.mrb[2].mxu0 %v1417_v23 }
  0x91   : > { %452 = vmatprep.mubr.f32.mxu0 %v1172_v0  ;;  %924 = vmatpush3.bf16.msra.mxu1 %v923_v37 }
  0x94   : > { %453 = vmatmul.mubr.f32.gmra.mrb[4].mxu0 %v1422_v24 }
  0x95   : > { %458 = vmatprep.mubr.f32.mxu0 %v1172_v0  ;;  %v366_v0 = vlaneseq }
  0x97   : > { %v367_v38 = vshrl.u32 %v366_v0, 7 }
  0x98   : > { %459 = vmatmul.mubr.f32.gmra.mrb[6].mxu0 %v1427_v25 }
  0x99   : > { %v368_v39 = vsub.s32 0, %v367_v38  ;;  %v372_v41 = vsub.s32 1, %v367_v38 }
  0x9b   : > { %v369_v42 = vrot.slane %v364_v40, %v368_v39  ;;  %v373_v43 = vrot.slane %v364_v40, %v372_v41 }
 0x15f   : > { %v442_v44 = vpop.f32.mrb[0].mxu0 }
 0x160   : > { %v443_v45 = vadd.f32 %v442_v44, %v369_v42  ;;  %v444_v46 = vpop.f32.mrb[1].mxu0 }
 0x161   : > { %v445_v47 = vadd.f32 %v444_v46, %v373_v43 }
 0x162   : > { %v473_v48 = vmul.f32 0.0, %v443_v45  ;;  %vm465_vm1 = vcmp.ge.f32.partialorder %v443_v45, 0.0 }
 0x163   : > { %v448_v49 = vpop.f32.mrb[2].mxu0  ;;  %vm466_vm0 = vcmp.ge.f32.partialorder %v445_v47, 0.0  ;;  %v474_v50 = vmul.f32 0.0, %v445_v47 }
 0x164   : > { %v449_v51 = vadd.f32 %v448_v49, %v369_v42  ;;  %v450_v52 = vpop.f32.mrb[3].mxu0  ;;  %v481_v56 = vsel %vm465_vm1, %v443_v45, %v473_v48 }
 0x165   : > { %v451_v53 = vadd.f32 %v450_v52, %v373_v43  ;;  %v482_v54 = vsel %vm466_vm0, %v445_v47, %v474_v50 }
 0x166   : > { %v475_v55 = vmul.f32 0.0, %v449_v51  ;;  %592 = vmatprep.mubr.f32.mxu1 %v482_v54  ;;  %vm467_vm3 = vcmp.ge.f32.partialorder %v449_v51, 0.0 }
 0x167   : > { %v476_v57 = vmul.f32 0.0, %v451_v53  ;;  %v454_v58 = vpop.f32.mrb[4].mxu0  ;;  %593 = vmatmul.mubr.f32.vlgmr.msra.gmra.mrb[0].mxu1 %v481_v56  ;;  %vm468_vm2 = vcmp.ge.f32.partialorder %v451_v53, 0.0 }
 0x168   : > { %v455_v59 = vadd.f32 %v454_v58, %v369_v42  ;;  %v456_v60 = vpop.f32.mrb[5].mxu0  ;;  %v483_v1 = vsel %vm467_vm3, %v449_v51, %v475_v55 }
 0x169   : > { %v457_v61 = vadd.f32 %v456_v60, %v373_v43  ;;  %v484_v62 = vsel %vm468_vm2, %v451_v53, %v476_v57 }
 0x16a   : > { %v477_v63 = vmul.f32 0.0, %v455_v59  ;;  %597 = vmatprep.mubr.f32.mxu1 %v484_v62  ;;  %vm469_vm5 = vcmp.ge.f32.partialorder %v455_v59, 0.0 }
 0x16b   : > { %v478_v2 = vmul.f32 0.0, %v457_v61  ;;  %v460_v3 = vpop.f32.mrb[6].mxu0  ;;  %598 = vmatmul.mubr.f32.gmra.mrb[2].mxu1 %v483_v1  ;;  %vm470_vm4 = vcmp.ge.f32.partialorder %v457_v61, 0.0  ;;  %v809_v1 = vld [vmem:[%s1504_s6] ss:$0 sm:$0xff] }
 0x16c   : > { %v461_v4 = vadd.f32 %v460_v3, %v369_v42  ;;  %v462_v5 = vpop.f32.mrb[7].mxu0  ;;  %v485_v9 = vsel %vm469_vm5, %v455_v59, %v477_v63 }
 0x16d   : > { %v463_v6 = vadd.f32 %v462_v5, %v373_v43  ;;  %v486_v7 = vsel %vm470_vm4, %v457_v61, %v478_v2  ;;  %v808_v61 = vld [vmem:[%s1503_s5] ss:$0 sm:$0xff] }
 0x16e   : > { %v479_v8 = vmul.f32 0.0, %v461_v4  ;;  %602 = vmatprep.mubr.f32.mxu1 %v486_v7  ;;  %vm471_vm7 = vcmp.ge.f32.partialorder %v461_v4, 0.0 }
 0x16f   : > { %v480_v10 = vmul.f32 0.0, %v463_v6  ;;  %603 = vmatmul.mubr.f32.gmra.mrb[4].mxu1 %v485_v9  ;;  %vm472_vm6 = vcmp.ge.f32.partialorder %v463_v6, 0.0 }
 0x170   : > { %v487_v12 = vsel %vm471_vm7, %v461_v4, %v479_v8 }
 0x171   : > { %v488_v11 = vsel %vm472_vm6, %v463_v6, %v480_v10 }
 0x172   : > { %607 = vmatprep.mubr.f32.mxu1 %v488_v11 }
 0x173   : > { %608 = vmatmul.mubr.f32.gmra.mrb[6].mxu1 %v487_v12 }
 0x23a   : > { %v849_v13 = vpop.f32.mrb[0].mxu1 }
 0x23b   : > { %v850_v15 = vpop.f32.mrb[1].mxu1 }
 0x23c   : > { %v851_v16 = vadd.f32 %v850_v15, %v849_v13 }
 0x23e   : > { %v595_v17 = vadd.f32 %v851_v16, %v807_v14  ;;  %v852_v18 = vpop.f32.mrb[2].mxu1 }
 0x23f   : > { %v853_v19 = vpop.f32.mrb[3].mxu1 }
 0x240   : > { %v854_v20 = vadd.f32 %v853_v19, %v852_v18  ;;  %v613_v22 = vadd.f32 %v595_v17, %v1412_v21 }
 0x242   : > { %v600_v26 = vadd.f32 %v854_v20, %v807_v14  ;;  %v855_v27 = vpop.f32.mrb[4].mxu1  ;;  %617 = vadd.xlane.f32.xlu0 %v613_v22 }
 0x243   : > { %v856_v28 = vpop.f32.mrb[5].mxu1 }
 0x244   : > { %v857_v29 = vadd.f32 %v856_v28, %v855_v27  ;;  %v614_v30 = vadd.f32 %v600_v26, %v1417_v23 }
 0x246   : > { %v605_v31 = vadd.f32 %v857_v29, %v807_v14  ;;  %v858_v32 = vpop.f32.mrb[6].mxu1  ;;  %619 = vadd.xlane.f32.xlu0 %v614_v30 }
 0x247   : > { %v859_v33 = vpop.f32.mrb[7].mxu1 }
 0x248   : > { %v860_v34 = vadd.f32 %v859_v33, %v858_v32  ;;  %v615_v35 = vadd.f32 %v605_v31, %v1422_v24 }
 0x24a   : > { %v610_v36 = vadd.f32 %v860_v34, %v807_v14  ;;  %621 = vadd.xlane.f32.xlu1 %v615_v35 }
 0x24c   : > { %v616_v37 = vadd.f32 %v610_v36, %v1427_v25 }
 0x24e   : > { %623 = vadd.xlane.f32.xlu1 %v616_v37 }
 0x2cf   : > { %v618_v21 = vpop.xlane.xlu0 %617 }
 0x2d0   : > { %v626_v0 = vmul.f32 0.0078125, %v618_v21 }
 0x2d2   : > { %v630_v38 = vsub.f32 %v613_v22, %v626_v0 }
 0x2d3   : > { %v620_v39 = vpop.xlane.xlu0 %619 }
 0x2d4   : > { %v627_v40 = vmul.f32 0.0078125, %v620_v39  ;;  %v634_v41 = vmul.f32 %v630_v38, %v630_v38 }
 0x2d6   : > { %v631_v42 = vsub.f32 %v614_v30, %v627_v40  ;;  %638 = vadd.xlane.f32.xlu0 %v634_v41 }
 0x2d7   : > { %v622_v23 = vpop.xlane.xlu1 %621 }
 0x2d8   : > { %v628_v43 = vmul.f32 0.0078125, %v622_v23  ;;  %v635_v44 = vmul.f32 %v631_v42, %v631_v42 }
 0x2da   : > { %v632_v45 = vsub.f32 %v615_v35, %v628_v43  ;;  %640 = vadd.xlane.f32.xlu1 %v635_v44 }
 0x2db   : > { %v624_v46 = vpop.xlane.xlu1 %623 }
 0x2dc   : > { %v629_v24 = vmul.f32 0.0078125, %v624_v46  ;;  %v636_v47 = vmul.f32 %v632_v45, %v632_v45 }
 0x2de   : > { %v633_v48 = vsub.f32 %v616_v37, %v629_v24  ;;  %642 = vadd.xlane.f32.xlu0 %v636_v47 }
 0x2e0   : > { %v637_v25 = vmul.f32 %v633_v48, %v633_v48 }
 0x2e2   : > { %644 = vadd.xlane.f32.xlu1 %v637_v25 }
 0x363   : > { %v639_v49 = vpop.xlane.xlu0 %638 }
 0x364   : > { %v646_v50 = vmul.f32 0.0078125, %v639_v49 }
 0x366   : > { %v650_v51 = vadd.f32 1e-05, %v646_v50 }
 0x367   : > { %v641_v52 = vpop.xlane.xlu1 %640 }
 0x368   : > { %999 = vrsqrt.f32 %v650_v51  ;;  %v647_v53 = vmul.f32 0.0078125, %v641_v52 }
 0x36a   : > { %v651_v54 = vadd.f32 1e-05, %v647_v53 }
 0x36b   : > { %v643_v55 = vpop.xlane.xlu0 %642 }
 0x36c   : > { %1001 = vrsqrt.f32 %v651_v54  ;;  %v648_v56 = vmul.f32 0.0078125, %v643_v55 }
 0x36e   : > { %v652_v57 = vadd.f32 1e-05, %v648_v56 }
 0x36f   : > { %v645_v58 = vpop.xlane.xlu1 %644 }
 0x370   : > { %1003 = vrsqrt.f32 %v652_v57  ;;  %v649_v59 = vmul.f32 0.0078125, %v645_v58 }
 0x372   : > { %v1000_v60 = vpop.eup %999  ;;  %v653_v62 = vadd.f32 1e-05, %v649_v59 }
 0x373   : > { %v658_v63 = vmul.f32 %v1000_v60, %v630_v38 }
 0x374   : > { %1005 = vrsqrt.f32 %v653_v62 }
 0x375   : > { %v669_v2 = vmul.f32 %v808_v61, %v658_v63 }
 0x376   : > { %v1002_v3 = vpop.eup %1001 }
 0x377   : > { %v680_v4 = vadd.f32 %v809_v1, %v669_v2  ;;  %v659_v5 = vmul.f32 %v1002_v3, %v631_v42 }
 0x379   : > { %684 = vst [vmem:[%s325_s21] sm:$0xff] %v680_v4  ;;  %v670_v6 = vmul.f32 %v808_v61, %v659_v5 }
 0x37a   : > { %v1004_v7 = vpop.eup %1003 }
 0x37b   : > { %v681_v8 = vadd.f32 %v809_v1, %v670_v6  ;;  %v660_v9 = vmul.f32 %v1004_v7, %v632_v45 }
 0x37d   : > { %685 = vst [vmem:[%s325_s21 + $0x8] sm:$0xff] %v681_v8  ;;  %v671_v10 = vmul.f32 %v808_v61, %v660_v9 }
 0x37e   : > { %v1006_v11 = vpop.eup %1005 }
 0x37f   : > { %v682_v12 = vadd.f32 %v809_v1, %v671_v10  ;;  %v661_v13 = vmul.f32 %v1006_v11, %v633_v48 }
 0x381   : > { %686 = vst [vmem:[%s325_s21 + $0x10] sm:$0xff] %v682_v12  ;;  %v672_v14 = vmul.f32 %v808_v61, %v661_v13 }
 0x383   : > { %v683_v15 = vadd.f32 %v809_v1, %v672_v14 }
 0x385   : > { %687 = vst [vmem:[%s325_s21 + $0x18] sm:$0xff] %v683_v15 }
 0x386   : > { %1106 = shalt.err (!%p1103_p2)
}
 0x387   : > { %s1107_s16 = scalar_lea.hbm %s1452_s29, 512  ;;  %s1111_s21 = scalar_lea.hbm %s1505_s7, 1024 }
 0x388   : > { %p1108_p13 = scmp.ne.s32.totalorder %s1452_s29, %s1107_s16  ;;  %p1112_p4 = scmp.lt.u32.totalorder %s1452_s29, %s1505_s7 }
 0x389   : > { %p1113_p7 = scmp.lt.u32.totalorder %s1111_s21, %s1107_s16  ;;  %p1115_p11 = scmp.lt.u32.totalorder %s1107_s16, %s1452_s29 }
 0x38a   : > { %p1109_p6 = pnand %p1108_p13, %p1521_p0 }
 0x38b   : > { %p1114_p8 = por %p1113_p7, %p1112_p4 }
 0x38c   : > { %p1110_p10 = pneg %p1109_p6 }
 0x38d   : > { %p1116_p1 = por %p1115_p11, %p1114_p8 }
 0x38f   : > { %p1117_p3 = pnand %p1116_p1, %p1110_p10 }
 0x391   : > { %1120 = shalt.err (!%p1117_p3)
}
 0x392   : > { %s1174_s30 = smov 128   ;;  %s1175_s23 = smov 8  }
 0x393   : > { %935 = dma.vmem_to_hbm [thread:$0]  (%p1521_p0), %s1454_s18, 512, %s1452_s29, %s689_s9, %s1174_s30, %s1174_s30, %s1175_s23  }
 0x394 PF: > { %s717_s28 = sand.u32 1, %s1151_s24   ;;  %p1522_p5 = scmp.ne.s32.totalorder %s1511_s8, 0 }
 0x395   : > { %p1523_p9 = scmp.ge.s32.totalorder %s1163_s27, 2  ;;  %s718_s11 = scalar_lea.sflag [#allocation4], %s717_s28 }
 0x397   : > { %p949_p12 = pnand %p1523_p9, %p1522_p5 }
 0x399   : > { %1146 = dma.done.wait (!%p949_p12), %s718_s11, 512  }
 0x39a   : > { %1148 = vsyncadd (!%p949_p12), %s718_s11, 4294966784  ;;  %p21_p2 = scmp.ge.s32.totalorder %s1329_s13, 4   ;;  %s1524_s24 = smov %s1155_s25 }
 0x39b   : > { %s1525_s25 = smov %s1159_s26  ;;  %s1526_s26 = smov %s1338_s17 }
 0x39c   : > { %s1527_s27 = smov %s1329_s13  ;;  %23 = sbr.rel (!%p21_p2) target bundleno = 6 (0x6), region = 101 }
 0x3a3   :  { %723 = vsyncpa [#allocation3], 1 }
 0x3a4   :  { %725 = vsyncpa [#allocation3 + $0x1], 1 }
 0x3a5   :  { %726 = vsyncpa [#allocation6], 1 }
 0x3a6   :  { %727 = vsyncpa [#allocation4], 1 }
 0x3a7   :  { %729 = vsyncpa [#allocation4 + $0x1], 1 }

</bundles_post_ra>
